<compile_context>
chip_gen: v7x
topology: tpu7x:2x2x1
jax: 0.10.0
libtpu: 0.0.40
codegen_flags: <defaults>
</compile_context>

<pallas_src>
import functools

import jax
import jax.numpy as jnp
from jax.experimental import pallas as pl
from jax.experimental.pallas import tpu as pltpu


def _round_up(v, m):
    return ((v + m - 1) // m) * m


def _round_down(v, m):
    return max(m, (v // m) * m)


def manifold_layer_kernel(x_ref, w_ref, bias_ref, o_ref):
    # x_ref:    (TB, DinP)     activation dtype (bf16 stays bf16; MXU
    #                          accumulates in f32 via preferred_element_type)
    # w_ref:    (DinP, DoutP)  folded weight W_sum, activation dtype
    # bias_ref: (2, DoutP)     f32; row 0 = pre-relu folded bias, row 1 = exp base
    # o_ref:    (TB, DoutP)
    acc = jnp.dot(x_ref[...], w_ref[...],
                  preferred_element_type=jnp.float32)       # (TB, DoutP) f32
    bias = bias_ref[...]
    acc = acc + bias[0:1, :]                                 # pre-relu fold
    acc = jnp.maximum(acc, 0.0)                              # relu
    acc = acc + bias[1:2, :]                                 # Euclidean exp map
    o_ref[...] = acc.astype(o_ref.dtype)


def manifold_layer(x, log_base, weight, exp_base, *, tb=None,
                   single_buffer_invariants=True):
    """x: (B, Din); log_base: (P, Din); weight: (Dout, P*Din) [nn.Linear layout];
    exp_base: (Dout,).  Returns (B, Dout)."""
    B, din = x.shape
    num_poles = log_base.shape[0]
    dout = weight.shape[0]
    assert weight.shape[1] == num_poles * din

    itemsize = jnp.dtype(x.dtype).itemsize

    # --- algebraic fold (valid for Euclidean log/exp only) -------------------
    # weight.T reshaped to (P, Din, Dout) matches the (B, P, Din) flatten order.
    w_sum = jnp.sum(weight.T.reshape(num_poles, din, dout).astype(jnp.float32),
                    axis=0)                                  # (Din, Dout) f32
    b_pre = -(log_base.reshape(1, num_poles * din).astype(jnp.float32)
              @ weight.T.astype(jnp.float32))                # (1, Dout) f32

    # --- layout padding ------------------------------------------------------
    # Lane-dense output: Dout -> multiple of 128.  K dim: tiny Din -> 128 so
    # MXU pushes are full width (numerically free; no-op if Din >= 128).
    dout_p = _round_up(dout, 128)
    din_p = din if din >= 128 else 128

    # Keep MXU operands in the activation dtype (bf16 stays bf16 on v6e/v7x).
    # Note: summing the P weights in f32 and rounding once differs slightly
    # from P separate low-precision matmuls when params are bf16 (exact in f32).
    w_sum = w_sum.astype(x.dtype)
    if (din_p, dout_p) != (din, dout):
        w_sum = jnp.pad(w_sum, ((0, din_p - din), (0, dout_p - dout)))
    bias = jnp.zeros((2, dout_p), jnp.float32)
    bias = bias.at[0, :dout].set(b_pre[0])
    bias = bias.at[1, :dout].set(exp_base.astype(jnp.float32))
    x_in = x if din_p == din else jnp.pad(x, ((0, 0), (0, din_p - din)))

    # --- batch tiling (no batch pad; partial last block is masked by Pallas) --
    row_align = {4: 8, 2: 16, 1: 32}.get(itemsize, 8)   # sublane packing granule
    if tb is None:
        # ~1 MiB of (x + out) rows per tile: big enough that the ~0.35 us
        # per-grid-step pipeline overhead stops dominating at small Din.
        tb = _round_down((1 << 20) // max(1, (din_p + dout_p) * itemsize),
                         row_align)
        tb = min(tb, 4096)
    else:
        tb = _round_down(int(tb), row_align)
    b_ceil = _round_up(B, row_align)
    if b_ceil >= 2 * row_align:
        # >= 2 grid steps whenever the batch allows it (v7x has 2 TensorCores).
        tb = min(tb, _round_up(pl.cdiv(b_ceil, 2), row_align))
    tb = max(row_align, min(tb, b_ceil))
    grid = (pl.cdiv(B, tb),)

    # --- explicit VMEM budget (v5e's scoped default is only 16 MiB) ----------
    inv_bufs = 1 if single_buffer_invariants else 2
    vmem_bytes = (2 * tb * din_p * itemsize              # x tiles, double-buffered
                  + inv_bufs * din_p * dout_p * itemsize  # folded weight
                  + inv_bufs * 2 * dout_p * 4             # merged bias
                  + 2 * tb * dout_p * itemsize)           # out tiles, double-buffered
    vmem_limit = min(int(1.5 * vmem_bytes) + (8 << 20), 127 << 20)

    # Advisory cost estimate (real dtype sizes, unpadded batch).
    cost = pl.CostEstimate(
        flops=2 * B * din * dout,
        transcendentals=0,
        bytes_accessed=(B * din * itemsize + din_p * dout_p * itemsize
                        + 2 * dout_p * 4 + B * dout_p * itemsize),
    )

    # Grid-invariant operands: their index_map is constant, so double-buffering
    # them is pure VMEM waste — request single buffering (v7x: 64 MiB VMEM).
    inv_kwargs = ({"pipeline_mode": pl.Buffered(1)}
                  if single_buffer_invariants else {})

    out = pl.pallas_call(
        manifold_layer_kernel,
        out_shape=jax.ShapeDtypeStruct((B, dout_p), x.dtype),
        grid_spec=pltpu.PrefetchScalarGridSpec(
            num_scalar_prefetch=0,
            grid=grid,
            in_specs=[
                pl.BlockSpec((tb, din_p), lambda i: (i, 0)),
                pl.BlockSpec((din_p, dout_p), lambda i: (0, 0), **inv_kwargs),
                pl.BlockSpec((2, dout_p), lambda i: (0, 0), **inv_kwargs),
            ],
            out_specs=pl.BlockSpec((tb, dout_p), lambda i: (i, 0)),
        ),
        compiler_params=pltpu.CompilerParams(
            dimension_semantics=("parallel",),
            vmem_limit_bytes=vmem_limit),
        cost_estimate=cost,
    )(x_in, w_sum, bias)

    return out[:, :dout] if dout_p != dout else out


def manifold_layer_ref(x, log_base, weight, exp_base):
    """Pure-JAX reference mirroring the PyTorch forward (no fold)."""
    log_x = x[:, None, :] - log_base[None, :, :]             # (B, P, Din)
    log_x_flat = log_x.reshape(x.shape[0], -1)               # (B, P*Din)
    lin = log_x_flat @ weight.T                              # (B, Dout)
    lin = jnp.maximum(lin, 0.0)                              # relu
    return exp_base[None, :] + lin                           # (B, Dout)


if __name__ == "__main__":
    # Module hyperparameters (small, consistent with __init__ signature).
    batch = 8
    in_dimension = 32
    out_dimension = 32
    num_poles = 3

    key = jax.random.PRNGKey(0)
    k_x, k_x2, k_logb, k_w, k_expb = jax.random.split(key, 5)

    x = jax.random.normal(k_x, (batch, in_dimension), dtype=jnp.float32)
    # Deterministic parameter init (synthetic, not a checkpoint load).
    log_base = 0.1 * jax.random.normal(k_logb, (num_poles, in_dimension),
                                       dtype=jnp.float32)
    weight = jax.random.normal(
        k_w, (out_dimension, num_poles * in_dimension),
        dtype=jnp.float32) / jnp.sqrt(jnp.float32(num_poles * in_dimension))
    exp_base = 0.1 * jax.random.normal(k_expb, (out_dimension,),
                                       dtype=jnp.float32)

    def run(inputs, single_buffer):
        fn = jax.jit(functools.partial(manifold_layer,
                                       single_buffer_invariants=single_buffer))
        return jax.block_until_ready(fn(*inputs))

    args = (x, log_base, weight, exp_base)
    try:
        single_buffer = True
        out = run(args, single_buffer)
    except Exception:
        # Fallback for jax builds where pipeline_mode=pl.Buffered(1) is not
        # accepted on a pallas_call BlockSpec: double-buffer the invariants.
        single_buffer = False
        out = run(args, single_buffer)

    ref = manifold_layer_ref(*args)
    assert out.shape == (batch, out_dimension)
    assert jnp.allclose(out, ref, atol=1e-5, rtol=1e-5)

    # Second case: B=20 exercises a >=2-step batch grid AND a masked partial
    # last block on-device (B is not a multiple of the chosen tile).
    x2 = jax.random.normal(k_x2, (20, in_dimension), dtype=jnp.float32)
    args2 = (x2, log_base, weight, exp_base)
    out2 = run(args2, single_buffer)
    ref2 = manifold_layer_ref(*args2)
    assert out2.shape == (20, out_dimension)
    assert jnp.allclose(out2, ref2, atol=1e-5, rtol=1e-5)

    print("KERNEL_OK")
</pallas_src>

<mosaic_0001>
module attributes {stable_mosaic.version = 11 : i64} {
  func.func @manifold_layer_kernel(%arg0: i32, %arg1: memref<8x128xf32, #tpu.memory_space<vmem>>, %arg2: memref<128x128xf32, #tpu.memory_space<vmem>>, %arg3: memref<2x128xf32, #tpu.memory_space<vmem>>, %arg4: memref<8x128xf32, #tpu.memory_space<vmem>>) attributes {dimension_semantics = [#tpu.dimension_semantics<parallel>], iteration_bounds = array<i64: 1>, scalar_prefetch = 0 : i64, scratch_operands = 0 : i64, tpu.core_type = #tpu.core_type<tc>, window_params = [{transform_indices = @transform_0, window_bounds = array<i64: 8, 128>}, {pipeline_mode = #tpu.pipeline_mode<synchronous>, transform_indices = @transform_1, window_bounds = array<i64: 128, 128>}, {pipeline_mode = #tpu.pipeline_mode<synchronous>, transform_indices = @transform_2, window_bounds = array<i64: 2, 128>}, {transform_indices = @transform_3, window_bounds = array<i64: 8, 128>}]} {
    %c0 = arith.constant 0 : index
    %c0_0 = arith.constant 0 : index
    %0 = vector.load %arg1[%c0, %c0_0] : memref<8x128xf32, #tpu.memory_space<vmem>>, vector<8x128xf32>
    %c0_1 = arith.constant 0 : index
    %c0_2 = arith.constant 0 : index
    %1 = vector.load %arg2[%c0_1, %c0_2] : memref<128x128xf32, #tpu.memory_space<vmem>>, vector<128x128xf32>
    %cst = arith.constant dense<0.000000e+00> : vector<8x128xf32>
    %2 = tpu.matmul %0, %1, %cst {dimension_numbers = #tpu.dot_dimension_numbers<[1], [0], [0], [1], [0, 0, 1, 1], [], []>} : vector<8x128xf32>, vector<128x128xf32>, vector<8x128xf32> -> vector<8x128xf32>
    %c0_3 = arith.constant 0 : index
    %c0_4 = arith.constant 0 : index
    %3 = vector.load %arg3[%c0_3, %c0_4] : memref<2x128xf32, #tpu.memory_space<vmem>>, vector<2x128xf32>
    %4 = vector.extract_strided_slice %3 {offsets = [0, 0], sizes = [1, 128], strides = [1, 1]} : vector<2x128xf32> to vector<1x128xf32>
    %5 = vector.broadcast %4 : vector<1x128xf32> to vector<8x128xf32>
    %6 = arith.addf %2, %5 : vector<8x128xf32>
    %cst_5 = arith.constant 0.000000e+00 : f32
    %7 = vector.broadcast %cst_5 : f32 to vector<8x128xf32>
    %8 = arith.maximumf %6, %7 : vector<8x128xf32>
    %9 = vector.extract_strided_slice %3 {offsets = [1, 0], sizes = [1, 128], strides = [1, 1]} : vector<2x128xf32> to vector<1x128xf32>
    %10 = vector.broadcast %9 : vector<1x128xf32> to vector<8x128xf32>
    %11 = arith.addf %8, %10 : vector<8x128xf32>
    %c0_6 = arith.constant 0 : index
    %c0_7 = arith.constant 0 : index
    %12 = vector.load %arg4[%c0_6, %c0_7] : memref<8x128xf32, #tpu.memory_space<vmem>>, vector<8x128xf32>
    tpu.vector_store %arg4[%c0_6, %c0_7], %11 {strides = array<i32>} : memref<8x128xf32, #tpu.memory_space<vmem>>, vector<8x128xf32>,
    return
  }
  func.func @transform_0(%arg0: i32) -> (i32, i32) {
    %c0_i32 = arith.constant 0 : i32
    %c0_i32_0 = arith.constant 0 : i32
    return %arg0, %c0_i32 : i32, i32
  }
  func.func @transform_1(%arg0: i32) -> (i32, i32) {
    %c0_i32 = arith.constant 0 : i32
    %c0_i32_0 = arith.constant 0 : i32
    %c0_i32_1 = arith.constant 0 : i32
    return %c0_i32, %c0_i32_0 : i32, i32
  }
  func.func @transform_2(%arg0: i32) -> (i32, i32) {
    %c0_i32 = arith.constant 0 : i32
    %c0_i32_0 = arith.constant 0 : i32
    %c0_i32_1 = arith.constant 0 : i32
    return %c0_i32, %c0_i32_0 : i32, i32
  }
  func.func @transform_3(%arg0: i32) -> (i32, i32) {
    %c0_i32 = arith.constant 0 : i32
    %c0_i32_0 = arith.constant 0 : i32
    return %arg0, %c0_i32 : i32, i32
  }
}

module attributes {stable_mosaic.version = 11 : i64} {
  func.func @manifold_layer_kernel(%arg0: i32, %arg1: memref<8x128xf32, #tpu.memory_space<vmem>>, %arg2: memref<128x128xf32, #tpu.memory_space<vmem>>, %arg3: memref<2x128xf32, #tpu.memory_space<vmem>>, %arg4: memref<8x128xf32, #tpu.memory_space<vmem>>) attributes {dimension_semantics = [#tpu.dimension_semantics<parallel>], iteration_bounds = array<i64: 1>, scalar_prefetch = 0 : i64, scratch_operands = 0 : i64, tpu.core_type = #tpu.core_type<tc>, window_params = [{transform_indices = @transform_0, window_bounds = array<i64: 8, 128>}, {pipeline_mode = #tpu.pipeline_mode<synchronous>, transform_indices = @transform_1, window_bounds = array<i64: 128, 128>}, {pipeline_mode = #tpu.pipeline_mode<synchronous>, transform_indices = @transform_2, window_bounds = array<i64: 2, 128>}, {transform_indices = @transform_3, window_bounds = array<i64: 8, 128>}]} {
    %c0 = arith.constant 0 : index
    %c0_0 = arith.constant 0 : index
    %0 = vector.load %arg1[%c0, %c0_0] : memref<8x128xf32, #tpu.memory_space<vmem>>, vector<8x128xf32>
    %c0_1 = arith.constant 0 : index
    %c0_2 = arith.constant 0 : index
    %1 = vector.load %arg2[%c0_1, %c0_2] : memref<128x128xf32, #tpu.memory_space<vmem>>, vector<128x128xf32>
    %cst = arith.constant dense<0.000000e+00> : vector<8x128xf32>
    %2 = tpu.matmul %0, %1, %cst {dimension_numbers = #tpu.dot_dimension_numbers<[1], [0], [0], [1], [0, 0, 1, 1], [], []>} : vector<8x128xf32>, vector<128x128xf32>, vector<8x128xf32> -> vector<8x128xf32>
    %c0_3 = arith.constant 0 : index
    %c0_4 = arith.constant 0 : index
    %3 = vector.load %arg3[%c0_3, %c0_4] : memref<2x128xf32, #tpu.memory_space<vmem>>, vector<2x128xf32>
    %4 = vector.extract_strided_slice %3 {offsets = [0, 0], sizes = [1, 128], strides = [1, 1]} : vector<2x128xf32> to vector<1x128xf32>
    %5 = vector.broadcast %4 : vector<1x128xf32> to vector<8x128xf32>
    %6 = arith.addf %2, %5 : vector<8x128xf32>
    %cst_5 = arith.constant 0.000000e+00 : f32
    %7 = vector.broadcast %cst_5 : f32 to vector<8x128xf32>
    %8 = arith.maximumf %6, %7 : vector<8x128xf32>
    %9 = vector.extract_strided_slice %3 {offsets = [1, 0], sizes = [1, 128], strides = [1, 1]} : vector<2x128xf32> to vector<1x128xf32>
    %10 = vector.broadcast %9 : vector<1x128xf32> to vector<8x128xf32>
    %11 = arith.addf %8, %10 : vector<8x128xf32>
    %c0_6 = arith.constant 0 : index
    %c0_7 = arith.constant 0 : index
    %12 = vector.load %arg4[%c0_6, %c0_7] : memref<8x128xf32, #tpu.memory_space<vmem>>, vector<8x128xf32>
    tpu.vector_store %arg4[%c0_6, %c0_7], %11 {strides = array<i32>} : memref<8x128xf32, #tpu.memory_space<vmem>>, vector<8x128xf32>,
    return
  }
  func.func @transform_0(%arg0: i32) -> (i32, i32) {
    %c0_i32 = arith.constant 0 : i32
    %c0_i32_0 = arith.constant 0 : i32
    return %arg0, %c0_i32 : i32, i32
  }
  func.func @transform_1(%arg0: i32) -> (i32, i32) {
    %c0_i32 = arith.constant 0 : i32
    %c0_i32_0 = arith.constant 0 : i32
    %c0_i32_1 = arith.constant 0 : i32
    return %c0_i32, %c0_i32_0 : i32, i32
  }
  func.func @transform_2(%arg0: i32) -> (i32, i32) {
    %c0_i32 = arith.constant 0 : i32
    %c0_i32_0 = arith.constant 0 : i32
    %c0_i32_1 = arith.constant 0 : i32
    return %c0_i32, %c0_i32_0 : i32, i32
  }
  func.func @transform_3(%arg0: i32) -> (i32, i32) {
    %c0_i32 = arith.constant 0 : i32
    %c0_i32_0 = arith.constant 0 : i32
    return %arg0, %c0_i32 : i32, i32
  }
}

</mosaic_0001>

<bundles_post_ra>
// kernel: manifold_layer.1
= control target key start
LH: loop header
LB: loop body
LE: loop exit
PB: predicated region body
PF: predicated region fallthrough
CT: control target
= control target key end

     0   :  { %v232_v3 = vmov 0.0|0.0   ;;  %vm233_vm0 = vmmov 0   ;;  %v234_v6 = vmov 0.0   ;;  %s322_s0 = inlined_call_operand.vmem [shape: f32[8,128], index: 0, kind: input, shape index: {}]   ;;  %s323_s1 = inlined_call_operand.vmem [shape: f32[128,128], index: 1, kind: input, shape index: {}]   ;;  %s324_s2 = inlined_call_operand.vmem [shape: f32[2,128], index: 2, kind: input, shape index: {}]   ;;  %s325_s3 = inlined_call_operand.hbm [shape: f32[8,128], index: 3, kind: output, shape index: {}]  }
   0x1   :  { %v16_v0 = vld [vmem:[%s323_s1] sm:$0xff]  ;;  %v17_v1 = vld [vmem:[%s323_s1 + $0x8] sm:$0xff]  ;;  %v18_v2 = vld [vmem:[%s323_s1 + $0x10] sm:$0xff]  ;;  %180 = vmatprep.subr.bf16.mxu0 %v232_v3  ;;  %177 = vmatprep.mubr.msk.f32.mxu0 %vm233_vm0, %v234_v6 }
   0x2   :  { %v181_v4 = vpack.c.bf16 %v17_v1, %v16_v0  ;;  %v19_v5 = vld [vmem:[%s323_s1 + $0x18] sm:$0xff]  ;;  %v20_v8 = vld [vmem:[%s323_s1 + $0x20] sm:$0xff]  ;;  %v21_v9 = vld [vmem:[%s323_s1 + $0x28] sm:$0xff] }
   0x3   :  { %v184_v7 = vpack.c.bf16 %v19_v5, %v18_v2 }
   0x4   :  { %182 = vmatpush3.bf16.msra.mxu0 %v181_v4 }
   0x5   :  { %183 = vmatprep.subr.bf16.mxu0 %v232_v3 }
   0x6   :  { %8 = vsyncpa [#allocation3], 0  ;;  %v187_v10 = vpack.c.bf16 %v21_v9, %v20_v8  ;;  %v22_v11 = vld [vmem:[%s323_s1 + $0x30] sm:$0xff]  ;;  %v23_v12 = vld [vmem:[%s323_s1 + $0x38] sm:$0xff]  ;;  %v33_v27 = vlaneseq }
   0x7   :  { %v190_v13 = vpack.c.bf16 %v23_v12, %v22_v11  ;;  %v24_v14 = vld [vmem:[%s323_s1 + $0x40] sm:$0xff]  ;;  %v25_v15 = vld [vmem:[%s323_s1 + $0x48] sm:$0xff]  ;;  %v26_v17 = vld [vmem:[%s323_s1 + $0x50] sm:$0xff] }
   0x8   :  { %185 = vmatpush3.bf16.msra.mxu0 %v184_v7  ;;  %v193_v16 = vpack.c.bf16 %v25_v15, %v24_v14  ;;  %v27_v18 = vld [vmem:[%s323_s1 + $0x58] sm:$0xff]  ;;  %v28_v20 = vld [vmem:[%s323_s1 + $0x60] sm:$0xff]  ;;  %v29_v21 = vld [vmem:[%s323_s1 + $0x68] sm:$0xff]  ;;  %v34_v28 = vshrl.u32 %v33_v27, 7 }
   0x9   :  { %186 = vmatprep.subr.bf16.mxu0 %v232_v3  ;;  %v196_v19 = vpack.c.bf16 %v27_v18, %v26_v17  ;;  %v199_v22 = vpack.c.bf16 %v29_v21, %v28_v20  ;;  %v30_v23 = vld [vmem:[%s323_s1 + $0x70] sm:$0xff]  ;;  %v31_v24 = vld [vmem:[%s323_s1 + $0x78] sm:$0xff]  ;;  %v15_v26 = vld [vmem:[%s322_s0] sm:$0xff]  ;;  %s235_s1 = smov [#allocation2]  }
   0xa   :  { %v202_v25 = vpack.c.bf16 %v31_v24, %v30_v23  ;;  %v35_v29 = vsub.s32 0, %v34_v28  ;;  %v32_v30 = vld [vmem:[%s324_s2] sm:$0x3]  ;;  %v110_v32 = vsub.s32 1, %v34_v28  ;;  %s120_s21 = sshll.u32 %s235_s1, 4  ;;  %s121_s21 = int_to_ptr.vmem [resolvable:$true] %s120_s21 }
   0xb   :  { %s208_s0 = scalar_lea.vmem %s121_s21, 128  ;;  %p213_p1 = scmp.lt.s32.totalorder %s121_s21, %s121_s21 }
   0xc   :  { %188 = vmatpush3.bf16.msra.mxu0 %v187_v10  ;;  %v36_v31 = vrot.slane %v32_v30, %v35_v29  ;;  %v111_v36 = vrot.slane %v32_v30, %v110_v32  ;;  %p209_p0 = scmp.ne.s32.totalorder %s121_s21, %s208_s0  ;;  %p214_p2 = scmp.lt.s32.totalorder %s208_s0, %s208_s0 }
   0xd   :  { %189 = vmatprep.subr.bf16.mxu0 %v232_v3 }
   0xe   :  { %p215_p3 = por %p214_p2, %p213_p1 }
  0x10   :  { %191 = vmatpush3.bf16.msra.mxu0 %v190_v13  ;;  %p216_p4 = pnand %p215_p3, %p209_p0 }
  0x11   :  { %192 = vmatprep.subr.bf16.mxu0 %v232_v3 }
  0x14   :  { %194 = vmatpush3.bf16.msra.mxu0 %v193_v16 }
  0x15   :  { %195 = vmatprep.subr.bf16.mxu0 %v232_v3 }
  0x18   :  { %197 = vmatpush3.bf16.msra.mxu0 %v196_v19 }
  0x19   :  { %198 = vmatprep.subr.bf16.mxu0 %v232_v3 }
  0x1c   :  { %200 = vmatpush3.bf16.msra.mxu0 %v199_v22 }
  0x1d   :  { %201 = vmatprep.subr.bf16.mxu0 %v232_v3 }
  0x20   :  { %203 = vmatpush3.bf16.msra.mxu0 %v202_v25 }
  0x23   :  { %178 = vmatmul.mubr.f32.vlgmr.msra.gmra.mrb[0].mxu0 %v15_v26 }
  0xf6   :  { %v103_v33 = vpop.f32.mrb[0].mxu0 }
  0xf7   :  { %v104_v34 = vadd.f32 %v103_v33, %v36_v31  ;;  %v179_v35 = vpop.f32.mrb[1].mxu0 }
  0xf9   :  { %v107_v37 = vmax.f32 %v104_v34, 0.0 }
  0xfb   :  { %v112_v38 = vadd.f32 %v111_v36, %v107_v37 }
  0xfd   :  { %113 = vst [vmem:[#allocation2] sm:$0xff] %v112_v38 }
  0xfe   :  { %219 = shalt.err (!%p216_p4)
}
  0xff   :  { %s220_s23 = scalar_lea.hbm %s325_s3, 128 }
 0x100   :  { %p221_p5 = scmp.ne.s32.totalorder %s325_s3, %s220_s23  ;;  %p224_p6 = scmp.lt.u32.totalorder %s220_s23, %s325_s3 }
 0x102   :  { %p226_p7 = pnand %p224_p6, %p221_p5 }
 0x104   :  { %229 = shalt.err (!%p226_p7)
}
 0x105   :  { %123 = dma.vmem_to_hbm [thread:$0]  %s121_s21, 128, %s325_s3, [#allocation3]  }
 0x106   :  { %230 = dma.done.wait [#allocation3], 128  }
 0x107   :  { %231 = vsyncadd [#allocation3], 4294967168 }
 0x108   :  { %127 = vsyncpa [#allocation3], 1 }

// kernel: manifold_layer.1
= control target key start
LH: loop header
LB: loop body
LE: loop exit
PB: predicated region body
PF: predicated region fallthrough
CT: control target
= control target key end

     0   :  { %v232_v3 = vmov 0.0|0.0   ;;  %vm233_vm0 = vmmov 0   ;;  %v234_v6 = vmov 0.0   ;;  %s322_s0 = inlined_call_operand.vmem [shape: f32[8,128], index: 0, kind: input, shape index: {}]   ;;  %s323_s1 = inlined_call_operand.vmem [shape: f32[128,128], index: 1, kind: input, shape index: {}]   ;;  %s324_s2 = inlined_call_operand.vmem [shape: f32[2,128], index: 2, kind: input, shape index: {}]   ;;  %s325_s3 = inlined_call_operand.hbm [shape: f32[8,128], index: 3, kind: output, shape index: {}]  }
   0x1   :  { %v16_v0 = vld [vmem:[%s323_s1] sm:$0xff]  ;;  %v17_v1 = vld [vmem:[%s323_s1 + $0x8] sm:$0xff]  ;;  %v18_v2 = vld [vmem:[%s323_s1 + $0x10] sm:$0xff]  ;;  %180 = vmatprep.subr.bf16.mxu0 %v232_v3  ;;  %177 = vmatprep.mubr.msk.f32.mxu0 %vm233_vm0, %v234_v6 }
   0x2   :  { %v181_v4 = vpack.c.bf16 %v17_v1, %v16_v0  ;;  %v19_v5 = vld [vmem:[%s323_s1 + $0x18] sm:$0xff]  ;;  %v20_v8 = vld [vmem:[%s323_s1 + $0x20] sm:$0xff]  ;;  %v21_v9 = vld [vmem:[%s323_s1 + $0x28] sm:$0xff] }
   0x3   :  { %v184_v7 = vpack.c.bf16 %v19_v5, %v18_v2 }
   0x4   :  { %182 = vmatpush3.bf16.msra.mxu0 %v181_v4 }
   0x5   :  { %183 = vmatprep.subr.bf16.mxu0 %v232_v3 }
   0x6   :  { %8 = vsyncpa [#allocation3], 0  ;;  %v187_v10 = vpack.c.bf16 %v21_v9, %v20_v8  ;;  %v22_v11 = vld [vmem:[%s323_s1 + $0x30] sm:$0xff]  ;;  %v23_v12 = vld [vmem:[%s323_s1 + $0x38] sm:$0xff]  ;;  %v33_v27 = vlaneseq }
   0x7   :  { %v190_v13 = vpack.c.bf16 %v23_v12, %v22_v11  ;;  %v24_v14 = vld [vmem:[%s323_s1 + $0x40] sm:$0xff]  ;;  %v25_v15 = vld [vmem:[%s323_s1 + $0x48] sm:$0xff]  ;;  %v26_v17 = vld [vmem:[%s323_s1 + $0x50] sm:$0xff] }
   0x8   :  { %185 = vmatpush3.bf16.msra.mxu0 %v184_v7  ;;  %v193_v16 = vpack.c.bf16 %v25_v15, %v24_v14  ;;  %v27_v18 = vld [vmem:[%s323_s1 + $0x58] sm:$0xff]  ;;  %v28_v20 = vld [vmem:[%s323_s1 + $0x60] sm:$0xff]  ;;  %v29_v21 = vld [vmem:[%s323_s1 + $0x68] sm:$0xff]  ;;  %v34_v28 = vshrl.u32 %v33_v27, 7 }
   0x9   :  { %186 = vmatprep.subr.bf16.mxu0 %v232_v3  ;;  %v196_v19 = vpack.c.bf16 %v27_v18, %v26_v17  ;;  %v199_v22 = vpack.c.bf16 %v29_v21, %v28_v20  ;;  %v30_v23 = vld [vmem:[%s323_s1 + $0x70] sm:$0xff]  ;;  %v31_v24 = vld [vmem:[%s323_s1 + $0x78] sm:$0xff]  ;;  %v15_v26 = vld [vmem:[%s322_s0] sm:$0xff]  ;;  %s235_s1 = smov [#allocation2]  }
   0xa   :  { %v202_v25 = vpack.c.bf16 %v31_v24, %v30_v23  ;;  %v35_v29 = vsub.s32 0, %v34_v28  ;;  %v32_v30 = vld [vmem:[%s324_s2] sm:$0x3]  ;;  %v110_v32 = vsub.s32 1, %v34_v28  ;;  %s120_s21 = sshll.u32 %s235_s1, 4  ;;  %s121_s21 = int_to_ptr.vmem [resolvable:$true] %s120_s21 }
   0xb   :  { %s208_s0 = scalar_lea.vmem %s121_s21, 128  ;;  %p213_p1 = scmp.lt.s32.totalorder %s121_s21, %s121_s21 }
   0xc   :  { %188 = vmatpush3.bf16.msra.mxu0 %v187_v10  ;;  %v36_v31 = vrot.slane %v32_v30, %v35_v29  ;;  %v111_v36 = vrot.slane %v32_v30, %v110_v32  ;;  %p209_p0 = scmp.ne.s32.totalorder %s121_s21, %s208_s0  ;;  %p214_p2 = scmp.lt.s32.totalorder %s208_s0, %s208_s0 }
   0xd   :  { %189 = vmatprep.subr.bf16.mxu0 %v232_v3 }
   0xe   :  { %p215_p3 = por %p214_p2, %p213_p1 }
  0x10   :  { %191 = vmatpush3.bf16.msra.mxu0 %v190_v13  ;;  %p216_p4 = pnand %p215_p3, %p209_p0 }
  0x11   :  { %192 = vmatprep.subr.bf16.mxu0 %v232_v3 }
  0x14   :  { %194 = vmatpush3.bf16.msra.mxu0 %v193_v16 }
  0x15   :  { %195 = vmatprep.subr.bf16.mxu0 %v232_v3 }
  0x18   :  { %197 = vmatpush3.bf16.msra.mxu0 %v196_v19 }
  0x19   :  { %198 = vmatprep.subr.bf16.mxu0 %v232_v3 }
  0x1c   :  { %200 = vmatpush3.bf16.msra.mxu0 %v199_v22 }
  0x1d   :  { %201 = vmatprep.subr.bf16.mxu0 %v232_v3 }
  0x20   :  { %203 = vmatpush3.bf16.msra.mxu0 %v202_v25 }
  0x23   :  { %178 = vmatmul.mubr.f32.vlgmr.msra.gmra.mrb[0].mxu0 %v15_v26 }
  0xf6   :  { %v103_v33 = vpop.f32.mrb[0].mxu0 }
  0xf7   :  { %v104_v34 = vadd.f32 %v103_v33, %v36_v31  ;;  %v179_v35 = vpop.f32.mrb[1].mxu0 }
  0xf9   :  { %v107_v37 = vmax.f32 %v104_v34, 0.0 }
  0xfb   :  { %v112_v38 = vadd.f32 %v111_v36, %v107_v37 }
  0xfd   :  { %113 = vst [vmem:[#allocation2] sm:$0xff] %v112_v38 }
  0xfe   :  { %219 = shalt.err (!%p216_p4)
}
  0xff   :  { %s220_s23 = scalar_lea.hbm %s325_s3, 128 }
 0x100   :  { %p221_p5 = scmp.ne.s32.totalorder %s325_s3, %s220_s23  ;;  %p224_p6 = scmp.lt.u32.totalorder %s220_s23, %s325_s3 }
 0x102   :  { %p226_p7 = pnand %p224_p6, %p221_p5 }
 0x104   :  { %229 = shalt.err (!%p226_p7)
}
 0x105   :  { %123 = dma.vmem_to_hbm [thread:$0]  %s121_s21, 128, %s325_s3, [#allocation3]  }
 0x106   :  { %230 = dma.done.wait [#allocation3], 128  }
 0x107   :  { %231 = vsyncadd [#allocation3], 4294967168 }
 0x108   :  { %127 = vsyncpa [#allocation3], 1 }

</bundles_post_ra>
